<compile_context>
chip_gen: v5e
topology: v5e:2x2
jax: 0.10.0
libtpu: 0.0.40
codegen_flags: <defaults>
</compile_context>

<pallas_src>
import functools

import numpy as np

import jax
import jax.numpy as jnp
from jax.experimental import pallas as pl
from jax.experimental.pallas import tpu as pltpu

_LANE = 128          # lane width of every activation / weight-tile half
_SLAB_W = 2 * _LANE  # slab width: even half in lanes 0..127, odd half in 128..255


# ----------------------------------------------------------------------------------
# Kernel
# ----------------------------------------------------------------------------------
def _custom_model_kernel(x_ref, c_ref, out_ref, *, off):
  """x_ref: (Bt, 128) bf16, c_ref: (R, 256) bf16 slab, out_ref: (Bt, 128) f32."""
  f32 = jnp.float32
  bf16 = jnp.bfloat16

  def wmat(name, lanes):
    # Full-tile weight slice: 8-aligned row start, lane start 0, width 128/256.
    r = off[name]
    return c_ref[r:r + _LANE, 0:lanes]

  def brow(name):
    # Bias rows are replicated to 8 sublanes on the host -> aligned (8,128) load.
    r = off[name]
    return c_ref[r:r + 8, 0:_LANE][0:1].astype(f32)          # (1, 128)

  x = x_ref[...]                                             # (Bt, 128) bf16

  # ---- conv1 + maxpool(2) + relu: one 256-wide matmul, split at lane 128 ----
  r1 = jnp.dot(x, wmat("w1", _SLAB_W), preferred_element_type=f32)     # (Bt, 256)
  h1 = jnp.maximum(jnp.maximum(r1[:, :_LANE], r1[:, _LANE:]) + brow("b1"), 0.0)

  # ---- conv2 + maxpool(2) + relu ----
  r2 = jnp.dot(h1.astype(bf16), wmat("w2", _SLAB_W), preferred_element_type=f32)
  h2 = jnp.maximum(jnp.maximum(r2[:, :_LANE], r2[:, _LANE:]) + brow("b2"), 0.0)

  # ---- fc stack (flatten is implicit: h2 is already channel-major on lanes) ----
  a1 = jnp.maximum(
      jnp.dot(h2.astype(bf16), wmat("l1", _LANE), preferred_element_type=f32)
      + brow("c1"), 0.0)
  # F.dropout with the module-default p=0 is the identity.
  # TODO(synk): stochastic dropout for p > 0 (training mode) not implemented; it
  # would use pltpu.prng_seed / pltpu.prng_random_bits.
  a2 = jnp.maximum(
      jnp.dot(a1.astype(bf16), wmat("l2", _LANE), preferred_element_type=f32)
      + brow("c2"), 0.0)
  y = (jnp.dot(a2.astype(bf16), wmat("l3", _LANE), preferred_element_type=f32)
       + brow("c3"))                                          # (Bt, 128): lane 0 real
  out_ref[...] = y.astype(out_ref.dtype)                      # lane-dense store


# ----------------------------------------------------------------------------------
# Host-side parameter folding / packing (runs once at model-build time)
# ----------------------------------------------------------------------------------
def _round_up(v, m):
  return -(-v // m) * m


def build_custom_model(params, *, n_inp, l_1, l_2, conv1_out, conv1_kernel,
                       conv2_kernel, block_b=None):
  """Fold conv/pool stages into banded matmul weights, pack into one bf16 slab."""
  C1, C2 = conv1_out, 2 * conv1_out
  K1, K2 = conv1_kernel, conv2_kernel
  PAD1, PAD2 = K1 - 1, K2 - 1
  L1 = n_inp + K1 - 1          # conv1 output length (padding = K1-1)
  P1 = L1 // 2                 # after MaxPool1d(2), floor mode
  L2 = P1 + K2 - 1             # conv2 output length (padding = K2-1)
  P2 = L2 // 2                 # after MaxPool1d(2)
  F = C2 * P2                  # lin1 in_features

  # TODO(synk): this packing assumes every activation fits one 128-lane tile;
  # larger models would need lane-tiled (multi-tile) weight blocks.
  assert max(n_inp, C1 * P1, F, l_1, l_2) <= _LANE, "activation exceeds 128 lanes"

  p = {k: np.asarray(v, np.float32) for k, v in params.items()}
  w1 = p["conv1_w"].reshape(C1, K1)            # in_channels = 1
  b1 = p["conv1_b"].reshape(C1)
  w2 = p["conv2_w"].reshape(C2, C1, K2)
  b2 = p["conv2_b"].reshape(C2)

  # conv1 as banded matmul:  x (B, n_inp) @ W1T (n_inp, C1*L1)   (zero-padding folded)
  W1T = np.zeros((n_inp, C1 * L1), np.float32)
  for c in range(C1):
    for t in range(L1):
      for k in range(K1):
        i = t + k - PAD1
        if 0 <= i < n_inp:
          W1T[i, c * L1 + t] = w1[c, k]

  # conv2 as block-banded matmul:  h1 (B, C1*P1) @ W2B (C1*P1, C2*L2)
  W2B = np.zeros((C1 * P1, C2 * L2), np.float32)
  for o in range(C2):
    for cin in range(C1):
      for t in range(L2):
        for k in range(K2):
          q = t + k - PAD2
          if 0 <= q < P1:
            W2B[cin * P1 + q, o * L2 + t] = w2[o, cin, k]

  # Fold MaxPool1d(2) into the conv matrices: even / odd output columns.
  ev1 = np.array([c * L1 + 2 * q for c in range(C1) for q in range(P1)], np.int64)
  ev2 = np.array([o * L2 + 2 * q for o in range(C2) for q in range(P2)], np.int64)

  def wblock(even, odd=None):
    # (128, 256) tile: even taps at lanes 0.., odd taps starting at lane 128.
    r, c = even.shape
    assert r <= _LANE and c <= _LANE
    blk = np.zeros((_LANE, _SLAB_W), np.float32)
    blk[:r, :c] = even
    if odd is not None:
      blk[:r, _LANE:_LANE + odd.shape[1]] = odd
    return blk

  def bblock(vec):
    # (8, 256) tile: bias row replicated to 8 sublanes, padded lanes exactly zero.
    blk = np.zeros((8, _SLAB_W), np.float32)
    blk[:, :vec.shape[0]] = vec[None, :]
    return blk

  named = [
      ("w1", wblock(W1T[:, ev1], W1T[:, ev1 + 1])),
      ("b1", bblock(np.repeat(b1, P1))),
      ("w2", wblock(W2B[:, ev2], W2B[:, ev2 + 1])),
      ("b2", bblock(np.repeat(b2, P2))),
      ("l1", wblock(p["lin1_w"].T)),
      ("c1", bblock(p["lin1_b"])),
      ("l2", wblock(p["lin2_w"].T)),
      ("c2", bblock(p["lin2_b"])),
      ("l3", wblock(p["lin3_w"].T)),
      ("c3", bblock(p["lin3_b"])),
  ]
  off, rows, blocks = {}, 0, []
  for name, blk in named:
    off[name] = rows                  # 8-aligned row offsets (128 or 8 row blocks)
    rows += blk.shape[0]
    blocks.append(blk)
  slab_np = np.concatenate(blocks, axis=0)             # (rows, 256)
  slab = jnp.asarray(slab_np, jnp.bfloat16)            # single bf16 constant operand
  slab_rows = int(slab_np.shape[0])

  kernel = functools.partial(_custom_model_kernel, off=off)
  slab_bytes = slab_rows * _SLAB_W * 2
  flops_per_row = 2 * (2 * _LANE * _SLAB_W + 3 * _LANE * _LANE)

  @jax.jit
  def forward(x):
    B = x.shape[0]
    bt = block_b if block_b is not None else max(8, min(512, _round_up(B, 8)))
    bt = _round_up(int(bt), 8)
    Bp = _round_up(B, bt)

    # Zero-pad x to (Bp, 128) bf16: lane-dense input DMA, aligned batch blocks.
    xb = jnp.zeros((Bp, _LANE), jnp.bfloat16)
    xb = xb.at[:B, :n_inp].set(x.astype(jnp.bfloat16))

    out = pl.pallas_call(
        kernel,
        out_shape=jax.ShapeDtypeStruct((Bp, _LANE), jnp.float32),
        grid=(Bp // bt,),
        in_specs=[
            pl.BlockSpec((bt, _LANE), lambda i: (i, 0)),          # x rows
            pl.BlockSpec((slab_rows, _SLAB_W), lambda i: (0, 0)),  # resident slab
        ],
        out_specs=pl.BlockSpec((bt, _LANE), lambda i: (i, 0)),
        compiler_params=pltpu.CompilerParams(
            dimension_semantics=("parallel",)),
        cost_estimate=pl.CostEstimate(
            flops=Bp * flops_per_row,
            transcendentals=0,
            bytes_accessed=Bp * _LANE * 2 + slab_bytes + Bp * _LANE * 4),
    )(xb, slab)
    return out[:B, :1]                 # real result lives in lane 0

  return forward


# ----------------------------------------------------------------------------------
# Pure-numpy reference (PyTorch semantics) for the correctness check
# ----------------------------------------------------------------------------------
def _reference_numpy(x, params, *, conv1_kernel, conv2_kernel):
  p = {k: np.asarray(v, np.float32) for k, v in params.items()}

  def conv1d(inp, w, b, pad):           # inp (B,Cin,L), w (Cout,Cin,K)
    B, Cin, L = inp.shape
    Cout, _, K = w.shape
    xp = np.pad(inp, ((0, 0), (0, 0), (pad, pad)))
    Lout = L + 2 * pad - K + 1
    out = np.zeros((B, Cout, Lout), np.float32)
    for o in range(Cout):
      acc = np.zeros((B, Lout), np.float32)
      for cin in range(Cin):
        for k in range(K):
          acc += w[o, cin, k] * xp[:, cin, k:k + Lout]
      out[:, o, :] = acc + b[o]
    return out

  def pool_relu(v):                     # MaxPool1d(2) (floor mode) then ReLU
    P = v.shape[2] // 2
    return np.maximum(np.maximum(v[:, :, 0:2 * P:2], v[:, :, 1:2 * P:2]), 0.0)

  h = np.asarray(x, np.float32)[:, None, :]
  h = pool_relu(conv1d(h, p["conv1_w"], p["conv1_b"], conv1_kernel - 1))
  h = pool_relu(conv1d(h, p["conv2_w"], p["conv2_b"], conv2_kernel - 1))
  f = h.reshape(h.shape[0], -1)
  a1 = np.maximum(f @ p["lin1_w"].T + p["lin1_b"], 0.0)
  a2 = np.maximum(a1 @ p["lin2_w"].T + p["lin2_b"], 0.0)
  return a2 @ p["lin3_w"].T + p["lin3_b"]


# ----------------------------------------------------------------------------------
if __name__ == "__main__":
  # Small, module-consistent sizes.
  n_inp, l_1, l_2 = 16, 32, 16
  conv1_out, K1, K2 = 4, 3, 3

  C1, C2 = conv1_out, 2 * conv1_out
  L1 = n_inp + K1 - 1
  P1 = L1 // 2
  L2 = P1 + K2 - 1
  P2 = L2 // 2
  F = C2 * P2                       # lin1 in_features (as derived via feature_stack)

  key = jax.random.PRNGKey(0)
  ks = jax.random.split(key, 11)

  def init(k, shape, fan_in):       # torch-like U(-1/sqrt(fan_in), 1/sqrt(fan_in))
    b = 1.0 / np.sqrt(fan_in)
    return jax.random.uniform(k, shape, jnp.float32, -b, b)

  params = {
      "conv1_w": init(ks[0], (C1, 1, K1), 1 * K1),
      "conv1_b": init(ks[1], (C1,), 1 * K1),
      "conv2_w": init(ks[2], (C2, C1, K2), C1 * K2),
      "conv2_b": init(ks[3], (C2,), C1 * K2),
      "lin1_w": init(ks[4], (l_1, F), F),
      "lin1_b": init(ks[5], (l_1,), F),
      "lin2_w": init(ks[6], (l_2, l_1), l_1),
      "lin2_b": init(ks[7], (l_2,), l_1),
      "lin3_w": init(ks[8], (1, l_2), l_2),
      "lin3_b": init(ks[9], (1,), l_2),
  }

  forward = build_custom_model(
      params, n_inp=n_inp, l_1=l_1, l_2=l_2, conv1_out=conv1_out,
      conv1_kernel=K1, conv2_kernel=K2)

  # --- small batch (single grid step) ---
  B = 2
  x = jax.random.normal(ks[10], (B, n_inp), jnp.float32)
  y = forward(x)
  jax.block_until_ready(y)
  assert y.shape == (B, 1) and y.dtype == jnp.float32
  ref = _reference_numpy(np.asarray(x), params, conv1_kernel=K1, conv2_kernel=K2)
  np.testing.assert_allclose(np.asarray(y), ref, rtol=5e-2, atol=5e-2)

  # --- exercise the multi-step batch grid path (padding + "parallel" batch axis) ---
  forward_tiled = build_custom_model(
      params, n_inp=n_inp, l_1=l_1, l_2=l_2, conv1_out=conv1_out,
      conv1_kernel=K1, conv2_kernel=K2, block_b=8)
  B2 = 19
  x2 = jax.random.normal(jax.random.PRNGKey(1), (B2, n_inp), jnp.float32)
  y2 = forward_tiled(x2)
  jax.block_until_ready(y2)
  assert y2.shape == (B2, 1)
  ref2 = _reference_numpy(np.asarray(x2), params, conv1_kernel=K1, conv2_kernel=K2)
  np.testing.assert_allclose(np.asarray(y2), ref2, rtol=5e-2, atol=5e-2)

  print("KERNEL_OK")
</pallas_src>

<mosaic_0001>
module attributes {stable_mosaic.version = 11 : i64} {
  func.func @_custom_model_kernel(%arg0: i32, %arg1: memref<8x128xbf16, #tpu.memory_space<vmem>>, %arg2: memref<680x256xbf16, #tpu.memory_space<vmem>>, %arg3: memref<8x128xf32, #tpu.memory_space<vmem>>) attributes {dimension_semantics = [#tpu.dimension_semantics<parallel>], iteration_bounds = array<i64: 1>, scalar_prefetch = 0 : i64, scratch_operands = 0 : i64, tpu.core_type = #tpu.core_type<tc>, window_params = [{transform_indices = @transform_0, window_bounds = array<i64: 8, 128>}, {pipeline_mode = #tpu.pipeline_mode<synchronous>, transform_indices = @transform_1, window_bounds = array<i64: 680, 256>}, {transform_indices = @transform_2, window_bounds = array<i64: 8, 128>}]} {
    %c0 = arith.constant 0 : index
    %c0_0 = arith.constant 0 : index
    %0 = vector.load %arg1[%c0, %c0_0] : memref<8x128xbf16, #tpu.memory_space<vmem>>, vector<8x128xbf16>
    %c0_1 = arith.constant 0 : index
    %c0_2 = arith.constant 0 : index
    %1 = vector.load %arg2[%c0_1, %c0_2] : memref<680x256xbf16, #tpu.memory_space<vmem>>, vector<128x256xbf16>
    %cst = arith.constant dense<0.000000e+00> : vector<8x256xf32>
    %2 = tpu.matmul %0, %1, %cst {dimension_numbers = #tpu.dot_dimension_numbers<[1], [0], [0], [1], [0, 0, 1, 1], [], []>} : vector<8x128xbf16>, vector<128x256xbf16>, vector<8x256xf32> -> vector<8x256xf32>
    %3 = vector.extract_strided_slice %2 {offsets = [0, 0], sizes = [8, 128], strides = [1, 1]} : vector<8x256xf32> to vector<8x128xf32>
    %4 = vector.extract_strided_slice %2 {offsets = [0, 128], sizes = [8, 128], strides = [1, 1]} : vector<8x256xf32> to vector<8x128xf32>
    %5 = arith.maximumf %3, %4 : vector<8x128xf32>
    %c128 = arith.constant 128 : index
    %c0_3 = arith.constant 0 : index
    %6 = vector.load %arg2[%c128, %c0_3] : memref<680x256xbf16, #tpu.memory_space<vmem>>, vector<8x128xbf16>
    %7 = vector.extract_strided_slice %6 {offsets = [0, 0], sizes = [1, 128], strides = [1, 1]} : vector<8x128xbf16> to vector<1x128xbf16>
    %8 = arith.extf %7 : vector<1x128xbf16> to vector<1x128xf32>
    %9 = vector.broadcast %8 : vector<1x128xf32> to vector<8x128xf32>
    %10 = arith.addf %5, %9 : vector<8x128xf32>
    %cst_4 = arith.constant 0.000000e+00 : f32
    %11 = vector.broadcast %cst_4 : f32 to vector<8x128xf32>
    %12 = arith.maximumf %10, %11 : vector<8x128xf32>
    %13 = arith.truncf %12 : vector<8x128xf32> to vector<8x128xbf16>
    %c136 = arith.constant 136 : index
    %c0_5 = arith.constant 0 : index
    %14 = vector.load %arg2[%c136, %c0_5] : memref<680x256xbf16, #tpu.memory_space<vmem>>, vector<128x256xbf16>
    %cst_6 = arith.constant dense<0.000000e+00> : vector<8x256xf32>
    %15 = tpu.matmul %13, %14, %cst_6 {dimension_numbers = #tpu.dot_dimension_numbers<[1], [0], [0], [1], [0, 0, 1, 1], [], []>} : vector<8x128xbf16>, vector<128x256xbf16>, vector<8x256xf32> -> vector<8x256xf32>
    %16 = vector.extract_strided_slice %15 {offsets = [0, 0], sizes = [8, 128], strides = [1, 1]} : vector<8x256xf32> to vector<8x128xf32>
    %17 = vector.extract_strided_slice %15 {offsets = [0, 128], sizes = [8, 128], strides = [1, 1]} : vector<8x256xf32> to vector<8x128xf32>
    %18 = arith.maximumf %16, %17 : vector<8x128xf32>
    %c264 = arith.constant 264 : index
    %c0_7 = arith.constant 0 : index
    %19 = vector.load %arg2[%c264, %c0_7] : memref<680x256xbf16, #tpu.memory_space<vmem>>, vector<8x128xbf16>
    %20 = vector.extract_strided_slice %19 {offsets = [0, 0], sizes = [1, 128], strides = [1, 1]} : vector<8x128xbf16> to vector<1x128xbf16>
    %21 = arith.extf %20 : vector<1x128xbf16> to vector<1x128xf32>
    %22 = vector.broadcast %21 : vector<1x128xf32> to vector<8x128xf32>
    %23 = arith.addf %18, %22 : vector<8x128xf32>
    %cst_8 = arith.constant 0.000000e+00 : f32
    %24 = vector.broadcast %cst_8 : f32 to vector<8x128xf32>
    %25 = arith.maximumf %23, %24 : vector<8x128xf32>
    %26 = arith.truncf %25 : vector<8x128xf32> to vector<8x128xbf16>
    %c272 = arith.constant 272 : index
    %c0_9 = arith.constant 0 : index
    %27 = vector.load %arg2[%c272, %c0_9] : memref<680x256xbf16, #tpu.memory_space<vmem>>, vector<128x128xbf16>
    %cst_10 = arith.constant dense<0.000000e+00> : vector<8x128xf32>
    %28 = tpu.matmul %26, %27, %cst_10 {dimension_numbers = #tpu.dot_dimension_numbers<[1], [0], [0], [1], [0, 0, 1, 1], [], []>} : vector<8x128xbf16>, vector<128x128xbf16>, vector<8x128xf32> -> vector<8x128xf32>
    %c400 = arith.constant 400 : index
    %c0_11 = arith.constant 0 : index
    %29 = vector.load %arg2[%c400, %c0_11] : memref<680x256xbf16, #tpu.memory_space<vmem>>, vector<8x128xbf16>
    %30 = vector.extract_strided_slice %29 {offsets = [0, 0], sizes = [1, 128], strides = [1, 1]} : vector<8x128xbf16> to vector<1x128xbf16>
    %31 = arith.extf %30 : vector<1x128xbf16> to vector<1x128xf32>
    %32 = vector.broadcast %31 : vector<1x128xf32> to vector<8x128xf32>
    %33 = arith.addf %28, %32 : vector<8x128xf32>
    %cst_12 = arith.constant 0.000000e+00 : f32
    %34 = vector.broadcast %cst_12 : f32 to vector<8x128xf32>
    %35 = arith.maximumf %33, %34 : vector<8x128xf32>
    %36 = arith.truncf %35 : vector<8x128xf32> to vector<8x128xbf16>
    %c408 = arith.constant 408 : index
    %c0_13 = arith.constant 0 : index
    %37 = vector.load %arg2[%c408, %c0_13] : memref<680x256xbf16, #tpu.memory_space<vmem>>, vector<128x128xbf16>
    %cst_14 = arith.constant dense<0.000000e+00> : vector<8x128xf32>
    %38 = tpu.matmul %36, %37, %cst_14 {dimension_numbers = #tpu.dot_dimension_numbers<[1], [0], [0], [1], [0, 0, 1, 1], [], []>} : vector<8x128xbf16>, vector<128x128xbf16>, vector<8x128xf32> -> vector<8x128xf32>
    %c536 = arith.constant 536 : index
    %c0_15 = arith.constant 0 : index
    %39 = vector.load %arg2[%c536, %c0_15] : memref<680x256xbf16, #tpu.memory_space<vmem>>, vector<8x128xbf16>
    %40 = vector.extract_strided_slice %39 {offsets = [0, 0], sizes = [1, 128], strides = [1, 1]} : vector<8x128xbf16> to vector<1x128xbf16>
    %41 = arith.extf %40 : vector<1x128xbf16> to vector<1x128xf32>
    %42 = vector.broadcast %41 : vector<1x128xf32> to vector<8x128xf32>
    %43 = arith.addf %38, %42 : vector<8x128xf32>
    %cst_16 = arith.constant 0.000000e+00 : f32
    %44 = vector.broadcast %cst_16 : f32 to vector<8x128xf32>
    %45 = arith.maximumf %43, %44 : vector<8x128xf32>
    %46 = arith.truncf %45 : vector<8x128xf32> to vector<8x128xbf16>
    %c544 = arith.constant 544 : index
    %c0_17 = arith.constant 0 : index
    %47 = vector.load %arg2[%c544, %c0_17] : memref<680x256xbf16, #tpu.memory_space<vmem>>, vector<128x128xbf16>
    %cst_18 = arith.constant dense<0.000000e+00> : vector<8x128xf32>
    %48 = tpu.matmul %46, %47, %cst_18 {dimension_numbers = #tpu.dot_dimension_numbers<[1], [0], [0], [1], [0, 0, 1, 1], [], []>} : vector<8x128xbf16>, vector<128x128xbf16>, vector<8x128xf32> -> vector<8x128xf32>
    %c672 = arith.constant 672 : index
    %c0_19 = arith.constant 0 : index
    %49 = vector.load %arg2[%c672, %c0_19] : memref<680x256xbf16, #tpu.memory_space<vmem>>, vector<8x128xbf16>
    %50 = vector.extract_strided_slice %49 {offsets = [0, 0], sizes = [1, 128], strides = [1, 1]} : vector<8x128xbf16> to vector<1x128xbf16>
    %51 = arith.extf %50 : vector<1x128xbf16> to vector<1x128xf32>
    %52 = vector.broadcast %51 : vector<1x128xf32> to vector<8x128xf32>
    %53 = arith.addf %48, %52 : vector<8x128xf32>
    %c0_20 = arith.constant 0 : index
    %c0_21 = arith.constant 0 : index
    %54 = vector.load %arg3[%c0_20, %c0_21] : memref<8x128xf32, #tpu.memory_space<vmem>>, vector<8x128xf32>
    tpu.vector_store %arg3[%c0_20, %c0_21], %53 {strides = array<i32>} : memref<8x128xf32, #tpu.memory_space<vmem>>, vector<8x128xf32>,
    return
  }
  func.func @transform_0(%arg0: i32) -> (i32, i32) {
    %c0_i32 = arith.constant 0 : i32
    %c0_i32_0 = arith.constant 0 : i32
    return %arg0, %c0_i32 : i32, i32
  }
  func.func @transform_1(%arg0: i32) -> (i32, i32) {
    %c0_i32 = arith.constant 0 : i32
    %c0_i32_0 = arith.constant 0 : i32
    %c0_i32_1 = arith.constant 0 : i32
    return %c0_i32, %c0_i32_0 : i32, i32
  }
  func.func @transform_2(%arg0: i32) -> (i32, i32) {
    %c0_i32 = arith.constant 0 : i32
    %c0_i32_0 = arith.constant 0 : i32
    return %arg0, %c0_i32 : i32, i32
  }
}

</mosaic_0001>

<bundles_post_ra>
// kernel: forward.1
= control target key start
LH: loop header
LB: loop body
LE: loop exit
PB: predicated region body
PF: predicated region fallthrough
CT: control target
= control target key end

     0   :  { %7 = vsyncpa [#allocation3], 0  ;;  %s845_s12 = smov [#allocation2]   ;;  %s846_s14 = smov 128   ;;  %s872_s0 = inlined_call_operand.vmem [shape: bf16[8,128], index: 0, kind: input, shape index: {}]   ;;  %s873_s1 = inlined_call_operand.hbm [shape: bf16[680,256], index: 1, kind: input, shape index: {}]   ;;  %s874_s2 = inlined_call_operand.vmem [shape: f32[8,128], index: 2, kind: output, shape index: {}]  }
   0x1   :  { %s14_s11 = sshll.u32 %s873_s1, 4  ;;  %s16_s13 = sshll.u32 %s845_s12, 4  ;;  %s15_s11 = int_to_ptr.hbm [resolvable:$true] %s14_s11  ;;  %s17_s13 = int_to_ptr.vmem [resolvable:$true] %s16_s13 }
   0x2   :  { %s847_s15 = smov 8  }
   0x3   :  { %22 = dma.hbm_to_vmem [thread:$0]  %s15_s11, 10880, %s17_s13, [#allocation3], %s846_s14, %s846_s14, %s847_s15  }
   0x4   :  { %843 = dma.done.wait [#allocation3], 10880  }
   0x5   :  { %844 = vsyncadd [#allocation3], 4294956416  ;;  %v594_v0 = vld [vmem:[#allocation2 + $0x70] sm:$0xf]  ;;  %v775_v1 = vld [vmem:[#allocation2 + $0x74] sm:$0xf0] }
   0x6   :  { %v774_v2 = vld [vmem:[#allocation2 + $0x74] sm:$0xf]  ;;  %v595_v3 = vor.u32 %v775_v1, %v594_v0  ;;  %v596_v4 = vld [vmem:[#allocation2 + $0x78] sm:$0xf0]  ;;  %v586_v5 = vld [vmem:[#allocation2 + $0x60] sm:$0xf] }
   0x7   :  { %v773_v6 = vld [vmem:[#allocation2 + $0x64] sm:$0xf0]  ;;  %v599_v7 = vor.u32 %v774_v2, %v596_v4  ;;  %v772_v8 = vld [vmem:[#allocation2 + $0x64] sm:$0xf]  ;;  %v588_v9 = vld [vmem:[#allocation2 + $0x68] sm:$0xf0] }
   0x8   :  { %124 = vmatpush.bf16.msra.mxu0 %v595_v3  ;;  %v587_v10 = vor.u32 %v773_v6, %v586_v5  ;;  %v591_v11 = vor.u32 %v772_v8, %v588_v9  ;;  %v578_v12 = vld [vmem:[#allocation2 + $0x50] sm:$0xf]  ;;  %v771_v13 = vld [vmem:[#allocation2 + $0x54] sm:$0xf0]  ;;  %v770_v14 = vld [vmem:[#allocation2 + $0x54] sm:$0xf] }
   0x9   :  { %137 = vmatpush.bf16.msra.mxu1 %v599_v7  ;;  %v580_v15 = vld [vmem:[#allocation2 + $0x58] sm:$0xf0]  ;;  %v579_v16 = vor.u32 %v771_v13, %v578_v12  ;;  %v570_v18 = vld [vmem:[#allocation2 + $0x40] sm:$0xf]  ;;  %v769_v19 = vld [vmem:[#allocation2 + $0x44] sm:$0xf0] }
   0xa   :  { %v583_v17 = vor.u32 %v770_v14, %v580_v15  ;;  %v768_v20 = vld [vmem:[#allocation2 + $0x44] sm:$0xf]  ;;  %v572_v21 = vld [vmem:[#allocation2 + $0x48] sm:$0xf0]  ;;  %v562_v22 = vld [vmem:[#allocation2 + $0x30] sm:$0xf]  ;;  %v571_v24 = vor.u32 %v769_v19, %v570_v18 }
   0xb   :  { %v767_v23 = vld [vmem:[#allocation2 + $0x34] sm:$0xf0]  ;;  %v766_v25 = vld [vmem:[#allocation2 + $0x34] sm:$0xf]  ;;  %v791_v27 = vld [vmem:[#allocation2 + $0xfc] sm:$0xf0]  ;;  %v575_v29 = vor.u32 %v768_v20, %v572_v21 }
   0xc   :  { %125 = vmatpush.bf16.msra.mxu0 %v587_v10  ;;  %v658_v26 = vld [vmem:[#allocation2 + $0xf8] sm:$0xf]  ;;  %v790_v28 = vld [vmem:[#allocation2 + $0xfc] sm:$0xf]  ;;  %v660_v31 = vld [vmem:[#allocation2 + $0x100] sm:$0xf0]  ;;  %v563_v39 = vor.u32 %v767_v23, %v562_v22 }
   0xd   :  { %138 = vmatpush.bf16.msra.mxu1 %v591_v11  ;;  %v659_v30 = vor.u32 %v791_v27, %v658_v26  ;;  %v650_v32 = vld [vmem:[#allocation2 + $0xe8] sm:$0xf]  ;;  %v789_v33 = vld [vmem:[#allocation2 + $0xec] sm:$0xf0]  ;;  %v564_v34 = vld [vmem:[#allocation2 + $0x38] sm:$0xf0]  ;;  %v663_v35 = vor.u32 %v790_v28, %v660_v31 }
   0xe   :  { %v788_v36 = vld [vmem:[#allocation2 + $0xec] sm:$0xf]  ;;  %v652_v37 = vld [vmem:[#allocation2 + $0xf0] sm:$0xf0]  ;;  %v651_v38 = vor.u32 %v789_v33, %v650_v32  ;;  %v554_v40 = vld [vmem:[#allocation2 + $0x20] sm:$0xf]  ;;  %v567_v44 = vor.u32 %v766_v25, %v564_v34 }
   0xf   :  { %253 = vmatpush.bf16.msra.mxu2 %v659_v30  ;;  %266 = vmatpush.bf16.msra.mxu3 %v663_v35  ;;  %v655_v41 = vor.u32 %v788_v36, %v652_v37  ;;  %v642_v42 = vld [vmem:[#allocation2 + $0xd8] sm:$0xf]  ;;  %v787_v43 = vld [vmem:[#allocation2 + $0xdc] sm:$0xf0]  ;;  %v765_v45 = vld [vmem:[#allocation2 + $0x24] sm:$0xf0] }
  0x10   :  { %126 = vmatpush.bf16.msra.mxu0 %v579_v16  ;;  %v786_v46 = vld [vmem:[#allocation2 + $0xdc] sm:$0xf]  ;;  %v644_v47 = vld [vmem:[#allocation2 + $0xe0] sm:$0xf0]  ;;  %v556_v49 = vld [vmem:[#allocation2 + $0x28] sm:$0xf0]  ;;  %v643_v50 = vor.u32 %v787_v43, %v642_v42  ;;  %v555_v51 = vor.u32 %v765_v45, %v554_v40 }
  0x11   :  { %139 = vmatpush.bf16.msra.mxu1 %v583_v17  ;;  %v764_v48 = vld [vmem:[#allocation2 + $0x24] sm:$0xf]  ;;  %v546_v52 = vld [vmem:[#allocation2 + $0x10] sm:$0xf]  ;;  %v647_v53 = vor.u32 %v786_v46, %v644_v47  ;;  %v634_v54 = vld [vmem:[#allocation2 + $0xc8] sm:$0xf] }
  0x12   :  { %v785_v55 = vld [vmem:[#allocation2 + $0xcc] sm:$0xf0]  ;;  %v559_v56 = vor.u32 %v764_v48, %v556_v49  ;;  %v763_v57 = vld [vmem:[#allocation2 + $0x14] sm:$0xf0]  ;;  %v784_v58 = vld [vmem:[#allocation2 + $0xcc] sm:$0xf] }
  0x13   :  { %254 = vmatpush.bf16.msra.mxu2 %v651_v38  ;;  %267 = vmatpush.bf16.msra.mxu3 %v655_v41  ;;  %v636_v59 = vld [vmem:[#allocation2 + $0xd0] sm:$0xf0]  ;;  %v548_v61 = vld [vmem:[#allocation2 + $0x18] sm:$0xf0]  ;;  %v635_v62 = vor.u32 %v785_v55, %v634_v54  ;;  %v547_v63 = vor.u32 %v763_v57, %v546_v52  ;;  %v538_v0 = vld [vmem:[#allocation2] sm:$0xf] }
  0x14   :  { %127 = vmatpush.bf16.msra.mxu0 %v571_v24  ;;  %v762_v60 = vld [vmem:[#allocation2 + $0x14] sm:$0xf]  ;;  %v639_v1 = vor.u32 %v784_v58, %v636_v59  ;;  %v626_v2 = vld [vmem:[#allocation2 + $0xb8] sm:$0xf]  ;;  %v783_v3 = vld [vmem:[#allocation2 + $0xbc] sm:$0xf0] }
  0x15   :  { %140 = vmatpush.bf16.msra.mxu1 %v575_v29  ;;  %v551_v4 = vor.u32 %v762_v60, %v548_v61  ;;  %v761_v5 = vld [vmem:[#allocation2 + $0x4] sm:$0xf0]  ;;  %v782_v6 = vld [vmem:[#allocation2 + $0xbc] sm:$0xf]  ;;  %v628_v7 = vld [vmem:[#allocation2 + $0xc0] sm:$0xf0]  ;;  %v627_v10 = vor.u32 %v783_v3, %v626_v2 }
  0x16   :  { %v760_v8 = vld [vmem:[#allocation2 + $0x4] sm:$0xf]  ;;  %v540_v9 = vld [vmem:[#allocation2 + $0x8] sm:$0xf0]  ;;  %v539_v11 = vor.u32 %v761_v5, %v538_v0  ;;  %v631_v12 = vor.u32 %v782_v6, %v628_v7  ;;  %v618_v13 = vld [vmem:[#allocation2 + $0xa8] sm:$0xf] }
  0x17   :  { %255 = vmatpush.bf16.msra.mxu2 %v643_v50  ;;  %268 = vmatpush.bf16.msra.mxu3 %v647_v53  ;;  %v781_v14 = vld [vmem:[#allocation2 + $0xac] sm:$0xf0]  ;;  %v543_v15 = vor.u32 %v760_v8, %v540_v9  ;;  %v780_v16 = vld [vmem:[#allocation2 + $0xac] sm:$0xf]  ;;  %v620_v17 = vld [vmem:[#allocation2 + $0xb0] sm:$0xf0] }
  0x18   :  { %128 = vmatpush.bf16.msra.mxu0 %v563_v39  ;;  %v619_v18 = vor.u32 %v781_v14, %v618_v13  ;;  %v27_v19 = vld [vmem:[%s872_s0] sm:$0xf]  ;;  %v623_v20 = vor.u32 %v780_v16, %v620_v17  ;;  %v610_v21 = vld [vmem:[#allocation2 + $0x98] sm:$0xf]  ;;  %v778_v23 = vld [vmem:[#allocation2 + $0x9c] sm:$0xf] }
  0x19   :  { %141 = vmatpush.bf16.msra.mxu1 %v567_v44  ;;  %v779_v22 = vld [vmem:[#allocation2 + $0x9c] sm:$0xf0]  ;;  %v612_v25 = vld [vmem:[#allocation2 + $0xa0] sm:$0xf0]  ;;  %v602_v27 = vld [vmem:[#allocation2 + $0x88] sm:$0xf] }
  0x1a   :  { %v611_v24 = vor.u32 %v779_v22, %v610_v21  ;;  %v615_v26 = vor.u32 %v778_v23, %v612_v25  ;;  %v777_v28 = vld [vmem:[#allocation2 + $0x8c] sm:$0xf0]  ;;  %v776_v29 = vld [vmem:[#allocation2 + $0x8c] sm:$0xf]  ;;  %v604_v31 = vld [vmem:[#allocation2 + $0x90] sm:$0xf0] }
  0x1b   :  { %256 = vmatpush.bf16.msra.mxu2 %v635_v62  ;;  %269 = vmatpush.bf16.msra.mxu3 %v639_v1  ;;  %v603_v30 = vor.u32 %v777_v28, %v602_v27  ;;  %v607_v32 = vor.u32 %v776_v29, %v604_v31  ;;  %v694_v33 = vld [vmem:[#allocation2 + $0x180] sm:$0xf]  ;;  %v799_v34 = vld [vmem:[#allocation2 + $0x184] sm:$0xf0]  ;;  %v690_v35 = vld [vmem:[#allocation2 + $0x170] sm:$0xf] }
  0x1c   :  { %129 = vmatpush.bf16.msra.mxu0 %v555_v51  ;;  %v695_v36 = vor.u32 %v799_v34, %v694_v33  ;;  %v798_v37 = vld [vmem:[#allocation2 + $0x174] sm:$0xf0]  ;;  %v686_v39 = vld [vmem:[#allocation2 + $0x160] sm:$0xf]  ;;  %v797_v40 = vld [vmem:[#allocation2 + $0x164] sm:$0xf0] }
  0x1d   :  { %142 = vmatpush.bf16.msra.mxu1 %v559_v56  ;;  %v691_v38 = vor.u32 %v798_v37, %v690_v35  ;;  %v687_v41 = vor.u32 %v797_v40, %v686_v39  ;;  %v682_v42 = vld [vmem:[#allocation2 + $0x150] sm:$0xf]  ;;  %v796_v43 = vld [vmem:[#allocation2 + $0x154] sm:$0xf0]  ;;  %v678_v45 = vld [vmem:[#allocation2 + $0x140] sm:$0xf] }
  0x1e   :  { %v683_v44 = vor.u32 %v796_v43, %v682_v42  ;;  %v795_v46 = vld [vmem:[#allocation2 + $0x144] sm:$0xf0]  ;;  %v151_v47 = vld [vmem:[#allocation2 + $0x80] sm:$0xf]  ;;  %v674_v49 = vld [vmem:[#allocation2 + $0x130] sm:$0xf] }
  0x1f   :  { %257 = vmatpush.bf16.msra.mxu2 %v627_v10  ;;  %270 = vmatpush.bf16.msra.mxu3 %v631_v12  ;;  %v679_v48 = vor.u32 %v795_v46, %v678_v45  ;;  %v794_v50 = vld [vmem:[#allocation2 + $0x134] sm:$0xf0]  ;;  %v152_v51 = vunpack.c.l.bf16 %v151_v47  ;;  %v670_v62 = vld [vmem:[#allocation2 + $0x120] sm:$0xf]  ;;  %v666_v1 = vld [vmem:[#allocation2 + $0x110] sm:$0xf] }
  0x20   :  { %130 = vmatpush.bf16.msra.mxu0 %v547_v63  ;;  %v675_v52 = vor.u32 %v794_v50, %v674_v49  ;;  %v793_v63 = vld [vmem:[#allocation2 + $0x124] sm:$0xf0]  ;;  %v792_v2 = vld [vmem:[#allocation2 + $0x114] sm:$0xf0]  ;;  %v807_v5 = vld [vmem:[#allocation2 + $0x20c] sm:$0xf0] }
  0x21   :  { %143 = vmatpush.bf16.msra.mxu1 %v551_v4  ;;  %v153_v54 = vperm.slane %v152_v51, 0  ;;  %v671_v0 = vor.u32 %v793_v63, %v670_v62  ;;  %v667_v3 = vor.u32 %v792_v2, %v666_v1  ;;  %v726_v4 = vld [vmem:[#allocation2 + $0x208] sm:$0xf]  ;;  %v722_v6 = vld [vmem:[#allocation2 + $0x1f8] sm:$0xf] }
  0x22   :  { %v727_v7 = vor.u32 %v807_v5, %v726_v4  ;;  %v806_v8 = vld [vmem:[#allocation2 + $0x1fc] sm:$0xf0]  ;;  %v718_v10 = vld [vmem:[#allocation2 + $0x1e8] sm:$0xf]  ;;  %v714_v13 = vld [vmem:[#allocation2 + $0x1d8] sm:$0xf] }
  0x23   :  { %258 = vmatpush.bf16.msra.mxu2 %v619_v18  ;;  %271 = vmatpush.bf16.msra.mxu3 %v623_v20  ;;  %v723_v9 = vor.u32 %v806_v8, %v722_v6  ;;  %v804_v14 = vld [vmem:[#allocation2 + $0x1dc] sm:$0xf0]  ;;  %v710_v16 = vld [vmem:[#allocation2 + $0x1c8] sm:$0xf]  ;;  %v803_v17 = vld [vmem:[#allocation2 + $0x1cc] sm:$0xf0] }
  0x24   :  { %131 = vmatpush.bf16.msra.mxu0 %v539_v11  ;;  %v805_v11 = vld [vmem:[#allocation2 + $0x1ec] sm:$0xf0]  ;;  %v280_v18 = vld [vmem:[#allocation2 + $0x108] sm:$0xf]  ;;  %v706_v20 = vld [vmem:[#allocation2 + $0x1b8] sm:$0xf] }
  0x25   :  { %144 = vmatpush.bf16.msra.mxu1 %v543_v15  ;;  %v719_v12 = vor.u32 %v805_v11, %v718_v10  ;;  %v715_v15 = vor.u32 %v804_v14, %v714_v13  ;;  %v802_v21 = vld [vmem:[#allocation2 + $0x1bc] sm:$0xf0]  ;;  %v281_v22 = vunpack.c.l.bf16 %v280_v18  ;;  %v702_v33 = vld [vmem:[#allocation2 + $0x1a8] sm:$0xf]  ;;  %v801_v34 = vld [vmem:[#allocation2 + $0x1ac] sm:$0xf0] }
  0x26   :  { %v707_v23 = vor.u32 %v802_v21, %v706_v20  ;;  %v703_v35 = vor.u32 %v801_v34, %v702_v33  ;;  %v800_v37 = vld [vmem:[#allocation2 + $0x19c] sm:$0xf0]  ;;  %v758_v39 = vld [vmem:[#allocation2 + $0x290] sm:$0xf]  ;;  %v815_v40 = vld [vmem:[#allocation2 + $0x294] sm:$0xf0] }
  0x27   :  { %132 = vmatmul.bf16.vlgmr.msra.gmra.mxu0 %v27_v19  ;;  %259 = vmatpush.bf16.msra.mxu2 %v611_v24  ;;  %v282_v24 = vperm.slane %v281_v22, 0  ;;  %v759_v42 = vor.u32 %v815_v40, %v758_v39  ;;  %v814_v43 = vld [vmem:[#allocation2 + $0x284] sm:$0xf0]  ;;  %v750_v45 = vld [vmem:[#allocation2 + $0x270] sm:$0xf] }
  0x28   :  { %145 = vmatmul.bf16.vlgmr.msra.gmra.mxu1 %v27_v19  ;;  %272 = vmatpush.bf16.msra.mxu3 %v615_v26  ;;  %v711_v19 = vor.u32 %v803_v17, %v710_v16  ;;  %v813_v46 = vld [vmem:[#allocation2 + $0x274] sm:$0xf0]  ;;  %v812_v49 = vld [vmem:[#allocation2 + $0x264] sm:$0xf0]  ;;  %v742_v51 = vld [vmem:[#allocation2 + $0x250] sm:$0xf] }
  0x29   :  { %353 = vmatpush.bf16.msrb.mxu0 %v695_v36  ;;  %435 = vmatpush.bf16.msrb.mxu1 %v727_v7  ;;  %v698_v36 = vld [vmem:[#allocation2 + $0x198] sm:$0xf]  ;;  %v751_v47 = vor.u32 %v813_v46, %v750_v45  ;;  %v734_v1 = vld [vmem:[#allocation2 + $0x230] sm:$0xf]  ;;  %v730_v4 = vld [vmem:[#allocation2 + $0x220] sm:$0xf] }
  0x2a   :  { %v809_v2 = vld [vmem:[#allocation2 + $0x234] sm:$0xf0]  ;;  %v808_v5 = vld [vmem:[#allocation2 + $0x224] sm:$0xf0] }
  0x2b   :  { %260 = vmatpush.bf16.msra.mxu2 %v603_v30  ;;  %v731_v6 = vor.u32 %v808_v5, %v730_v4  ;;  %v384_v7 = vld [vmem:[#allocation2 + $0x218] sm:$0xf] }
  0x2c   :  { %273 = vmatpush.bf16.msra.mxu3 %v607_v32  ;;  %v385_v8 = vunpack.c.l.bf16 %v384_v7 }
  0x2d   :  { %354 = vmatpush.bf16.msrb.mxu0 %v691_v38  ;;  %436 = vmatpush.bf16.msrb.mxu1 %v723_v9  ;;  %v699_v38 = vor.u32 %v800_v37, %v698_v36 }
  0x2e   :  { %v386_v9 = vperm.slane %v385_v8, 0 }
  0x2f   :  { %517 = vmatpush.bf16.msrb.mxu2 %v759_v42 }
  0x31   :  { %355 = vmatpush.bf16.msrb.mxu0 %v687_v41  ;;  %437 = vmatpush.bf16.msrb.mxu1 %v719_v12  ;;  %v754_v41 = vld [vmem:[#allocation2 + $0x280] sm:$0xf] }
  0x35   :  { %356 = vmatpush.bf16.msrb.mxu0 %v683_v44  ;;  %438 = vmatpush.bf16.msrb.mxu1 %v715_v15  ;;  %v755_v44 = vor.u32 %v814_v43, %v754_v41  ;;  %v466_v15 = vld [vmem:[#allocation2 + $0x2a0] sm:$0xf] }
  0x36   :  { %v467_v16 = vunpack.c.l.bf16 %v466_v15 }
  0x37   :  { %518 = vmatpush.bf16.msrb.mxu2 %v755_v44 }
  0x38   :  { %v468_v17 = vperm.slane %v467_v16, 0 }
  0x39   :  { %357 = vmatpush.bf16.msrb.mxu0 %v679_v48  ;;  %439 = vmatpush.bf16.msrb.mxu1 %v711_v19  ;;  %v746_v48 = vld [vmem:[#allocation2 + $0x260] sm:$0xf] }
  0x3a   :  { %v747_v50 = vor.u32 %v812_v49, %v746_v48 }
  0x3b   :  { %519 = vmatpush.bf16.msrb.mxu2 %v751_v47 }
  0x3d   :  { %358 = vmatpush.bf16.msrb.mxu0 %v675_v52  ;;  %440 = vmatpush.bf16.msrb.mxu1 %v707_v23  ;;  %v811_v52 = vld [vmem:[#allocation2 + $0x254] sm:$0xf0] }
  0x3f   :  { %520 = vmatpush.bf16.msrb.mxu2 %v747_v50 }
  0x41   :  { %359 = vmatpush.bf16.msrb.mxu0 %v671_v0  ;;  %441 = vmatpush.bf16.msrb.mxu1 %v703_v35 }
  0x45   :  { %360 = vmatpush.bf16.msrb.mxu0 %v667_v3  ;;  %442 = vmatpush.bf16.msrb.mxu1 %v699_v38  ;;  %v735_v3 = vor.u32 %v809_v2, %v734_v1 }
  0xa4   :  { %v133_v53 = vpop.f32.mrf.mxu0 }
  0xa5   :  { %v146_v55 = vpop.f32.mrf.mxu1 }
  0xa6   :  { %v150_v56 = vmax.f32 %v133_v53, %v146_v55  ;;  %v302_v53 = vld [vmem:[#allocation2 + $0x190] sm:$0xf]  ;;  %v738_v55 = vld [vmem:[#allocation2 + $0x240] sm:$0xf] }
  0xa8   :  { %v154_v57 = vadd.f32 %v153_v54, %v150_v56  ;;  %v743_v54 = vor.u32 %v811_v52, %v742_v51  ;;  %v810_v56 = vld [vmem:[#allocation2 + $0x244] sm:$0xf0] }
  0xaa   :  { %v155_v58 = vmax.f32 %v154_v57, 0.0  ;;  %v303_v57 = vunpack.c.l.bf16 %v302_v53  ;;  %521 = vmatpush.bf16.msrb.mxu2 %v743_v54 }
  0xac   :  { %v135_v59 = vpop.f32.mrf.mxu0  ;;  %v156_v60 = vpack.c.bf16 %v155_v58, %v155_v58  ;;  %v739_v58 = vor.u32 %v810_v56, %v738_v55 }
  0xad   :  { %v148_v61 = vpop.f32.mrf.mxu1  ;;  %v304_v59 = vperm.slane %v303_v57, 0 }
  0xae   :  { %261 = vmatmul.bf16.vlgmr.msra.gmra.mxu2 %v156_v60  ;;  %274 = vmatmul.bf16.vlgmr.msra.gmra.mxu3 %v156_v60 }
  0xaf   :  { %522 = vmatpush.bf16.msrb.mxu2 %v739_v58 }
  0xb3   :  { %523 = vmatpush.bf16.msrb.mxu2 %v735_v3 }
  0xb7   :  { %524 = vmatpush.bf16.msrb.mxu2 %v731_v6 }
 0x131   :  { %v262_v25 = vpop.f32.mrf.mxu2  ;;  %v275_v26 = vpop.f32.mrf.mxu3 }
 0x132   :  { %v279_v27 = vmax.f32 %v262_v25, %v275_v26 }
 0x134   :  { %v283_v28 = vadd.f32 %v282_v24, %v279_v27 }
 0x136   :  { %v284_v29 = vmax.f32 %v283_v28, 0.0 }
 0x138   :  { %v285_v30 = vpack.c.bf16 %v284_v29, %v284_v29 }
 0x139   :  { %v264_v31 = vpop.f32.mrf.mxu2  ;;  %v277_v32 = vpop.f32.mrf.mxu3 }
 0x13a   :  { %361 = vmatmul.bf16.vlgmr.msrb.gmra.mxu0 %v285_v30 }
 0x1b7   :  { %v362_v60 = vpop.f32.mrf.mxu0 }
 0x1b8   :  { %v363_v61 = vadd.f32 %v362_v60, %v304_v59 }
 0x1ba   :  { %v366_v62 = vmax.f32 %v363_v61, 0.0 }
 0x1bc   :  { %v367_v63 = vpack.c.bf16 %v366_v62, %v366_v62 }
 0x1be   :  { %443 = vmatmul.bf16.vlgmr.msrb.gmra.mxu1 %v367_v63 }
 0x1bf   :  { %v364_v0 = vpop.f32.mrf.mxu0 }
 0x23b   :  { %v444_v10 = vpop.f32.mrf.mxu1 }
 0x23c   :  { %v445_v11 = vadd.f32 %v444_v10, %v386_v9 }
 0x23e   :  { %v448_v12 = vmax.f32 %v445_v11, 0.0 }
 0x240   :  { %v449_v13 = vpack.c.bf16 %v448_v12, %v448_v12 }
 0x242   :  { %525 = vmatmul.bf16.vlgmr.msrb.gmra.mxu2 %v449_v13 }
 0x243   :  { %v446_v14 = vpop.f32.mrf.mxu1 }
 0x2c5   :  { %v526_v18 = vpop.f32.mrf.mxu2 }
 0x2c6   :  { %v527_v19 = vadd.f32 %v526_v18, %v468_v17 }
 0x2c8   :  { %530 = vst [vmem:[%s874_s2] sm:$0xff] %v527_v19 }
 0x2cd   :  { %v528_v20 = vpop.f32.mrf.mxu2 }
 0x2ce   :  { %535 = vsyncpa [#allocation3], 1 }

</bundles_post_ra>
